<compile_context>
chip_gen: v7x
topology: tpu7x:2x2x1
jax: 0.10.0
libtpu: 0.0.40
codegen_flags: <defaults>
</compile_context>

<pallas_src>
import functools

import jax
import jax.numpy as jnp
from jax import lax
from jax.experimental import pallas as pl
from jax.experimental.pallas import tpu as pltpu


def _residual_block_kernel(x_ref, wdw_ref, bdw_ref, gamma_ref, beta_ref,
                           wpw_ref, bpw_ref, o_ref, *,
                           k, W, tile_h, m_mult, eps):
    # x_ref    : [k, C_in, (tile_h+2p)*W]  bf16: dx-shifted, reflect-padded,
    #                                      H-halo'd tile (rows*W flattened on lanes)
    # wdw_ref  : [C_in, M*k*k]  depthwise weights, column m*kk + dy*k + dx
    # bdw_ref  : [C_in, M]      depthwise bias        (expanded channel h = c*M + m)
    # gamma_ref/beta_ref: [C_in, M]  LayerNorm affine
    # wpw_ref  : [C_out, C_hid] 1x1 conv weight
    # bpw_ref  : [C_out, 1]     1x1 conv bias
    # o_ref    : [C_out, tile_h*W]
    p = k // 2
    kk = k * k
    c_in = x_ref.shape[1]
    c_out = o_ref.shape[0]
    c_hid = c_in * m_mult
    thw = tile_h * W

    # ---- depthwise conv: per-tap loads (bounded live range); channel expansion
    # handled with M separate (C_in, THW) accumulators -> no sublane repeat.
    acc = [jnp.zeros((c_in, thw), jnp.float32) for _ in range(m_mult)]
    for dy in range(k):
        for dx in range(k):
            t = dy * k + dx
            x_t = x_ref[dx, :, dy * W: dy * W + thw].astype(jnp.float32)
            for m in range(m_mult):
                w_col = wdw_ref[:, m * kk + t: m * kk + t + 1].astype(jnp.float32)
                acc[m] = acc[m] + x_t * w_col
    for m in range(m_mult):
        acc[m] = acc[m] + bdw_ref[:, m:m + 1].astype(jnp.float32)

    # ---- LayerNorm over the C_hid channels (biased var, torch eps semantics).
    inv_c = 1.0 / float(c_hid)
    total = jnp.sum(acc[0], axis=0, keepdims=True)
    for m in range(1, m_mult):
        total = total + jnp.sum(acc[m], axis=0, keepdims=True)
    mean = total * inv_c
    centered = [a - mean for a in acc]
    sq = jnp.sum(centered[0] * centered[0], axis=0, keepdims=True)
    for m in range(1, m_mult):
        sq = sq + jnp.sum(centered[m] * centered[m], axis=0, keepdims=True)
    rstd = lax.rsqrt(sq * inv_c + eps)
    normed = [centered[m] * rstd * gamma_ref[:, m:m + 1].astype(jnp.float32)
              + beta_ref[:, m:m + 1].astype(jnp.float32)
              for m in range(m_mult)]

    # ---- 1x1 pointwise conv as VPU broadcast-MAC (channels too small for MXU):
    # out[o, :] = b_pw[o] + sum_h w_pw[o, h] * normed[h, :]
    out = jnp.zeros((c_out, thw), jnp.float32) + bpw_ref[...].astype(jnp.float32)
    for m in range(m_mult):
        for c in range(c_in):
            h = c * m_mult + m
            row = normed[m][c:c + 1, :]                         # (1, THW)
            col = wpw_ref[:, h:h + 1].astype(jnp.float32)       # (C_out, 1)
            out = out + row * col

    # ---- residual (center tap of the resident tile; C_out == C_in) + ReLU
    ident = x_ref[p, :, p * W: p * W + thw].astype(jnp.float32)
    out = jnp.maximum(out + ident, 0.0)
    o_ref[...] = out.astype(o_ref.dtype)


def _pick_tile_h(H, W, target_lanes=2048):
    """Largest divisor of H with tile_h*W <= target_lanes (keeps the f32 working
    set ~10s of KB, far below the 16/32 MiB default scoped VMEM on v5e/v6e/v7x,
    while giving the (B, H/tile_h) grid enough steps to pipeline)."""
    if H * W <= target_lanes:
        return H
    best = 1
    for th in range(1, H + 1):
        if H % th == 0 and th * W <= target_lanes:
            best = th
    return best


def residual_block_pallas(x_nchw, params, *, kernel_size, eps=1e-6,
                          storage_dtype=jnp.bfloat16, tile_h=None):
    w_dw = params["w_dw"]    # (C_hid, 1, k, k)   groups = C_in
    b_dw = params["b_dw"]    # (C_hid,)
    gamma = params["gamma"]  # (C_hid,)
    beta = params["beta"]    # (C_hid,)
    w_pw = params["w_pw"]    # (C_out, C_hid, 1, 1)
    b_pw = params["b_pw"]    # (C_out,)

    B, C_in, H, W = x_nchw.shape
    C_hid = w_dw.shape[0]
    C_out = w_pw.shape[0]
    assert C_hid % C_in == 0 and C_out == C_in
    M = C_hid // C_in
    k = kernel_size
    p = k // 2
    kk = k * k
    assert p <= H - 1 and p <= W - 1   # reflect-pad constraint (same as torch)

    if tile_h is None:
        tile_h = _pick_tile_h(H, W)
    assert H % tile_h == 0
    n_t = H // tile_h
    th_halo = tile_h + 2 * p
    thw = tile_h * W

    # Stage the input once in HBM (bf16): reflect pad, keep k W-shifted views,
    # cut overlapping H tiles (+halo) so plain Blocked indexing addresses them,
    # and flatten rows*W onto the lane axis.
    xp = jnp.pad(x_nchw, ((0, 0), (0, 0), (p, p), (p, p)),
                 mode="reflect").astype(storage_dtype)            # (B, C, H+2p, W+2p)
    shifts = jnp.stack([xp[:, :, :, dx:dx + W] for dx in range(k)],
                       axis=1)                                    # (B, k, C, H+2p, W)
    tiles = jnp.stack([shifts[:, :, :, t * tile_h: t * tile_h + th_halo, :]
                       for t in range(n_t)], axis=2)              # (B, k, nT, C, th_halo, W)
    xin = tiles.reshape(B, k, n_t, C_in, th_halo * W)

    # Pack parameters (tiny, f32): expanded channel h = c*M + m.
    wdw = w_dw.reshape(C_in, M, kk).reshape(C_in, M * kk).astype(jnp.float32)
    bdw = b_dw.reshape(C_in, M).astype(jnp.float32)
    gam = gamma.reshape(C_in, M).astype(jnp.float32)
    bet = beta.reshape(C_in, M).astype(jnp.float32)
    wpw = w_pw[:, :, 0, 0].astype(jnp.float32)                    # (C_out, C_hid)
    bpw = b_pw.reshape(C_out, 1).astype(jnp.float32)

    kernel = functools.partial(_residual_block_kernel, k=k, W=W, tile_h=tile_h,
                               m_mult=M, eps=eps)
    out = pl.pallas_call(
        kernel,
        out_shape=jax.ShapeDtypeStruct((B, n_t, C_out, thw), x_nchw.dtype),
        grid_spec=pltpu.PrefetchScalarGridSpec(
            num_scalar_prefetch=0,
            grid=(B, n_t),
            in_specs=[
                pl.BlockSpec((None, k, None, C_in, th_halo * W),
                             lambda b, t: (b, 0, t, 0, 0)),
                pl.BlockSpec((C_in, M * kk), lambda b, t: (0, 0)),
                pl.BlockSpec((C_in, M), lambda b, t: (0, 0)),
                pl.BlockSpec((C_in, M), lambda b, t: (0, 0)),
                pl.BlockSpec((C_in, M), lambda b, t: (0, 0)),
                pl.BlockSpec((C_out, C_hid), lambda b, t: (0, 0)),
                pl.BlockSpec((C_out, 1), lambda b, t: (0, 0)),
            ],
            out_specs=pl.BlockSpec((None, None, C_out, thw),
                                   lambda b, t: (b, t, 0, 0)),
        ),
        compiler_params=pltpu.CompilerParams(
            dimension_semantics=("parallel", "parallel")),
    )(xin, wdw, bdw, gam, bet, wpw, bpw)

    # (B, nT, C_out, tile_h*W) -> NCHW
    out = out.reshape(B, n_t, C_out, tile_h, W)
    out = jnp.transpose(out, (0, 2, 1, 3, 4)).reshape(B, C_out, H, W)
    return out


def residual_block_reference(x_nchw, params, *, kernel_size, eps=1e-6):
    """Independent plain-JAX reference matching the PyTorch forward (f32)."""
    w_dw, b_dw = params["w_dw"], params["b_dw"]
    gamma, beta = params["gamma"], params["beta"]
    w_pw, b_pw = params["w_pw"], params["b_pw"]
    B, C_in, H, W = x_nchw.shape
    k = kernel_size
    p = k // 2

    x = jnp.transpose(x_nchw, (0, 2, 3, 1)).astype(jnp.float32)  # NHWC
    xp = jnp.pad(x, ((0, 0), (p, p), (p, p), (0, 0)), mode="reflect")
    rhs = jnp.transpose(w_dw, (2, 3, 1, 0))                      # HWIO (k,k,1,C_hid)
    dw = lax.conv_general_dilated(
        xp, rhs, window_strides=(1, 1), padding="VALID",
        dimension_numbers=("NHWC", "HWIO", "NHWC"),
        feature_group_count=C_in,
        precision=lax.Precision.HIGHEST) + b_dw
    mean = jnp.mean(dw, axis=-1, keepdims=True)
    var = jnp.mean((dw - mean) ** 2, axis=-1, keepdims=True)
    nrm = (dw - mean) / jnp.sqrt(var + eps) * gamma + beta
    pw = jnp.einsum("bhwc,oc->bhwo", nrm, w_pw[:, :, 0, 0],
                    precision=lax.Precision.HIGHEST) + b_pw
    out = jnp.maximum(pw + x, 0.0)
    return jnp.transpose(out, (0, 3, 1, 2))


if __name__ == "__main__":
    key = jax.random.PRNGKey(0)
    B, C_in, H, W = 2, 4, 16, 16
    C_hid, C_out, k = 8, 4, 3

    keys = jax.random.split(key, 7)
    x = jax.random.normal(keys[0], (B, C_in, H, W), jnp.float32)
    params = dict(
        w_dw=0.3 * jax.random.normal(keys[1], (C_hid, 1, k, k), jnp.float32),
        b_dw=0.1 * jax.random.normal(keys[2], (C_hid,), jnp.float32),
        gamma=1.0 + 0.1 * jax.random.normal(keys[3], (C_hid,), jnp.float32),
        beta=0.1 * jax.random.normal(keys[4], (C_hid,), jnp.float32),
        w_pw=0.3 * jax.random.normal(keys[5], (C_out, C_hid, 1, 1), jnp.float32),
        b_pw=0.1 * jax.random.normal(keys[6], (C_out,), jnp.float32),
    )

    out = residual_block_pallas(x, params, kernel_size=k)
    out = jax.block_until_ready(out)
    assert out.shape == (B, C_out, H, W)

    # Tight check: feed the same bf16-rounded activations through the reference,
    # so the only remaining differences are f32 accumulation order.
    x_bf = x.astype(jnp.bfloat16).astype(jnp.float32)
    ref_tight = residual_block_reference(x_bf, params, kernel_size=k)
    assert jnp.allclose(out, ref_tight, rtol=2e-3, atol=2e-3)

    # Loose check against exact f32 module semantics (activations are stored
    # bf16 in HBM per the perf feedback, so tolerance is wider).
    ref_f32 = residual_block_reference(x, params, kernel_size=k)
    assert jnp.allclose(out, ref_f32, rtol=5e-2, atol=5e-2)

    print("KERNEL_OK")
</pallas_src>

<mosaic_0001>
module attributes {stable_mosaic.version = 11 : i64} {
  func.func @_residual_block_kernel(%arg0: i32, %arg1: i32, %arg2: memref<1x3x1x4x288xbf16, #tpu.memory_space<vmem>>, %arg3: memref<4x18xf32, #tpu.memory_space<vmem>>, %arg4: memref<4x2xf32, #tpu.memory_space<vmem>>, %arg5: memref<4x2xf32, #tpu.memory_space<vmem>>, %arg6: memref<4x2xf32, #tpu.memory_space<vmem>>, %arg7: memref<4x8xf32, #tpu.memory_space<vmem>>, %arg8: memref<4x1xf32, #tpu.memory_space<vmem>>, %arg9: memref<1x1x4x256xf32, #tpu.memory_space<vmem>>) attributes {dimension_semantics = [#tpu.dimension_semantics<parallel>, #tpu.dimension_semantics<parallel>], iteration_bounds = array<i64: 2, 1>, scalar_prefetch = 0 : i64, scratch_operands = 0 : i64, tpu.core_type = #tpu.core_type<tc>, window_params = [{transform_indices = @transform_0, window_bounds = array<i64: 1, 3, 1, 4, 288>}, {pipeline_mode = #tpu.pipeline_mode<synchronous>, transform_indices = @transform_1, window_bounds = array<i64: 4, 18>}, {pipeline_mode = #tpu.pipeline_mode<synchronous>, transform_indices = @transform_2, window_bounds = array<i64: 4, 2>}, {pipeline_mode = #tpu.pipeline_mode<synchronous>, transform_indices = @transform_3, window_bounds = array<i64: 4, 2>}, {pipeline_mode = #tpu.pipeline_mode<synchronous>, transform_indices = @transform_4, window_bounds = array<i64: 4, 2>}, {pipeline_mode = #tpu.pipeline_mode<synchronous>, transform_indices = @transform_5, window_bounds = array<i64: 4, 8>}, {pipeline_mode = #tpu.pipeline_mode<synchronous>, transform_indices = @transform_6, window_bounds = array<i64: 4, 1>}, {transform_indices = @transform_7, window_bounds = array<i64: 1, 1, 4, 256>}]} {
    %cst = arith.constant 0.000000e+00 : f32
    %0 = vector.broadcast %cst : f32 to vector<4x256xf32>
    %cst_0 = arith.constant 0.000000e+00 : f32
    %1 = vector.broadcast %cst_0 : f32 to vector<4x256xf32>
    %c0 = arith.constant 0 : index
    %c0_1 = arith.constant 0 : index
    %c0_2 = arith.constant 0 : index
    %c0_3 = arith.constant 0 : index
    %c0_4 = arith.constant 0 : index
    %2 = vector.load %arg2[%c0, %c0_1, %c0_2, %c0_3, %c0_4] : memref<1x3x1x4x288xbf16, #tpu.memory_space<vmem>>, vector<1x1x1x4x256xbf16>
    %3 = vector.shape_cast %2 : vector<1x1x1x4x256xbf16> to vector<4x256xbf16>
    %4 = arith.extf %3 : vector<4x256xbf16> to vector<4x256xf32>
    %c0_5 = arith.constant 0 : index
    %c0_6 = arith.constant 0 : index
    %5 = vector.load %arg3[%c0_5, %c0_6] : memref<4x18xf32, #tpu.memory_space<vmem>>, vector<4x1xf32>
    %6 = vector.broadcast %5 : vector<4x1xf32> to vector<4x256xf32>
    %7 = arith.mulf %4, %6 : vector<4x256xf32>
    %8 = arith.addf %0, %7 : vector<4x256xf32>
    %c0_7 = arith.constant 0 : index
    %c9 = arith.constant 9 : index
    %9 = vector.load %arg3[%c0_7, %c9] : memref<4x18xf32, #tpu.memory_space<vmem>>, vector<4x1xf32>
    %10 = vector.broadcast %9 : vector<4x1xf32> to vector<4x256xf32>
    %11 = arith.mulf %4, %10 : vector<4x256xf32>
    %12 = arith.addf %1, %11 : vector<4x256xf32>
    %c0_8 = arith.constant 0 : index
    %c1 = arith.constant 1 : index
    %c0_9 = arith.constant 0 : index
    %c0_10 = arith.constant 0 : index
    %c0_11 = arith.constant 0 : index
    %13 = vector.load %arg2[%c0_8, %c1, %c0_9, %c0_10, %c0_11] : memref<1x3x1x4x288xbf16, #tpu.memory_space<vmem>>, vector<1x1x1x4x256xbf16>
    %14 = vector.shape_cast %13 : vector<1x1x1x4x256xbf16> to vector<4x256xbf16>
    %15 = arith.extf %14 : vector<4x256xbf16> to vector<4x256xf32>
    %c0_12 = arith.constant 0 : index
    %c1_13 = arith.constant 1 : index
    %16 = vector.load %arg3[%c0_12, %c1_13] : memref<4x18xf32, #tpu.memory_space<vmem>>, vector<4x1xf32>
    %17 = vector.broadcast %16 : vector<4x1xf32> to vector<4x256xf32>
    %18 = arith.mulf %15, %17 : vector<4x256xf32>
    %19 = arith.addf %8, %18 : vector<4x256xf32>
    %c0_14 = arith.constant 0 : index
    %c10 = arith.constant 10 : index
    %20 = vector.load %arg3[%c0_14, %c10] : memref<4x18xf32, #tpu.memory_space<vmem>>, vector<4x1xf32>
    %21 = vector.broadcast %20 : vector<4x1xf32> to vector<4x256xf32>
    %22 = arith.mulf %15, %21 : vector<4x256xf32>
    %23 = arith.addf %12, %22 : vector<4x256xf32>
    %c0_15 = arith.constant 0 : index
    %c2 = arith.constant 2 : index
    %c0_16 = arith.constant 0 : index
    %c0_17 = arith.constant 0 : index
    %c0_18 = arith.constant 0 : index
    %24 = vector.load %arg2[%c0_15, %c2, %c0_16, %c0_17, %c0_18] : memref<1x3x1x4x288xbf16, #tpu.memory_space<vmem>>, vector<1x1x1x4x256xbf16>
    %25 = vector.shape_cast %24 : vector<1x1x1x4x256xbf16> to vector<4x256xbf16>
    %26 = arith.extf %25 : vector<4x256xbf16> to vector<4x256xf32>
    %c0_19 = arith.constant 0 : index
    %c2_20 = arith.constant 2 : index
    %27 = vector.load %arg3[%c0_19, %c2_20] : memref<4x18xf32, #tpu.memory_space<vmem>>, vector<4x1xf32>
    %28 = vector.broadcast %27 : vector<4x1xf32> to vector<4x256xf32>
    %29 = arith.mulf %26, %28 : vector<4x256xf32>
    %30 = arith.addf %19, %29 : vector<4x256xf32>
    %c0_21 = arith.constant 0 : index
    %c11 = arith.constant 11 : index
    %31 = vector.load %arg3[%c0_21, %c11] : memref<4x18xf32, #tpu.memory_space<vmem>>, vector<4x1xf32>
    %32 = vector.broadcast %31 : vector<4x1xf32> to vector<4x256xf32>
    %33 = arith.mulf %26, %32 : vector<4x256xf32>
    %34 = arith.addf %23, %33 : vector<4x256xf32>
    %c0_22 = arith.constant 0 : index
    %c0_23 = arith.constant 0 : index
    %c0_24 = arith.constant 0 : index
    %c0_25 = arith.constant 0 : index
    %c16 = arith.constant 16 : index
    %35 = vector.load %arg2[%c0_22, %c0_23, %c0_24, %c0_25, %c16] : memref<1x3x1x4x288xbf16, #tpu.memory_space<vmem>>, vector<1x1x1x4x256xbf16>
    %36 = vector.shape_cast %35 : vector<1x1x1x4x256xbf16> to vector<4x256xbf16>
    %37 = arith.extf %36 : vector<4x256xbf16> to vector<4x256xf32>
    %c0_26 = arith.constant 0 : index
    %c3 = arith.constant 3 : index
    %38 = vector.load %arg3[%c0_26, %c3] : memref<4x18xf32, #tpu.memory_space<vmem>>, vector<4x1xf32>
    %39 = vector.broadcast %38 : vector<4x1xf32> to vector<4x256xf32>
    %40 = arith.mulf %37, %39 : vector<4x256xf32>
    %41 = arith.addf %30, %40 : vector<4x256xf32>
    %c0_27 = arith.constant 0 : index
    %c12 = arith.constant 12 : index
    %42 = vector.load %arg3[%c0_27, %c12] : memref<4x18xf32, #tpu.memory_space<vmem>>, vector<4x1xf32>
    %43 = vector.broadcast %42 : vector<4x1xf32> to vector<4x256xf32>
    %44 = arith.mulf %37, %43 : vector<4x256xf32>
    %45 = arith.addf %34, %44 : vector<4x256xf32>
    %c0_28 = arith.constant 0 : index
    %c1_29 = arith.constant 1 : index
    %c0_30 = arith.constant 0 : index
    %c0_31 = arith.constant 0 : index
    %c16_32 = arith.constant 16 : index
    %46 = vector.load %arg2[%c0_28, %c1_29, %c0_30, %c0_31, %c16_32] : memref<1x3x1x4x288xbf16, #tpu.memory_space<vmem>>, vector<1x1x1x4x256xbf16>
    %47 = vector.shape_cast %46 : vector<1x1x1x4x256xbf16> to vector<4x256xbf16>
    %48 = arith.extf %47 : vector<4x256xbf16> to vector<4x256xf32>
    %c0_33 = arith.constant 0 : index
    %c4 = arith.constant 4 : index
    %49 = vector.load %arg3[%c0_33, %c4] : memref<4x18xf32, #tpu.memory_space<vmem>>, vector<4x1xf32>
    %50 = vector.broadcast %49 : vector<4x1xf32> to vector<4x256xf32>
    %51 = arith.mulf %48, %50 : vector<4x256xf32>
    %52 = arith.addf %41, %51 : vector<4x256xf32>
    %c0_34 = arith.constant 0 : index
    %c13 = arith.constant 13 : index
    %53 = vector.load %arg3[%c0_34, %c13] : memref<4x18xf32, #tpu.memory_space<vmem>>, vector<4x1xf32>
    %54 = vector.broadcast %53 : vector<4x1xf32> to vector<4x256xf32>
    %55 = arith.mulf %48, %54 : vector<4x256xf32>
    %56 = arith.addf %45, %55 : vector<4x256xf32>
    %c0_35 = arith.constant 0 : index
    %c2_36 = arith.constant 2 : index
    %c0_37 = arith.constant 0 : index
    %c0_38 = arith.constant 0 : index
    %c16_39 = arith.constant 16 : index
    %57 = vector.load %arg2[%c0_35, %c2_36, %c0_37, %c0_38, %c16_39] : memref<1x3x1x4x288xbf16, #tpu.memory_space<vmem>>, vector<1x1x1x4x256xbf16>
    %58 = vector.shape_cast %57 : vector<1x1x1x4x256xbf16> to vector<4x256xbf16>
    %59 = arith.extf %58 : vector<4x256xbf16> to vector<4x256xf32>
    %c0_40 = arith.constant 0 : index
    %c5 = arith.constant 5 : index
    %60 = vector.load %arg3[%c0_40, %c5] : memref<4x18xf32, #tpu.memory_space<vmem>>, vector<4x1xf32>
    %61 = vector.broadcast %60 : vector<4x1xf32> to vector<4x256xf32>
    %62 = arith.mulf %59, %61 : vector<4x256xf32>
    %63 = arith.addf %52, %62 : vector<4x256xf32>
    %c0_41 = arith.constant 0 : index
    %c14 = arith.constant 14 : index
    %64 = vector.load %arg3[%c0_41, %c14] : memref<4x18xf32, #tpu.memory_space<vmem>>, vector<4x1xf32>
    %65 = vector.broadcast %64 : vector<4x1xf32> to vector<4x256xf32>
    %66 = arith.mulf %59, %65 : vector<4x256xf32>
    %67 = arith.addf %56, %66 : vector<4x256xf32>
    %c0_42 = arith.constant 0 : index
    %c0_43 = arith.constant 0 : index
    %c0_44 = arith.constant 0 : index
    %c0_45 = arith.constant 0 : index
    %c32 = arith.constant 32 : index
    %68 = vector.load %arg2[%c0_42, %c0_43, %c0_44, %c0_45, %c32] : memref<1x3x1x4x288xbf16, #tpu.memory_space<vmem>>, vector<1x1x1x4x256xbf16>
    %69 = vector.shape_cast %68 : vector<1x1x1x4x256xbf16> to vector<4x256xbf16>
    %70 = arith.extf %69 : vector<4x256xbf16> to vector<4x256xf32>
    %c0_46 = arith.constant 0 : index
    %c6 = arith.constant 6 : index
    %71 = vector.load %arg3[%c0_46, %c6] : memref<4x18xf32, #tpu.memory_space<vmem>>, vector<4x1xf32>
    %72 = vector.broadcast %71 : vector<4x1xf32> to vector<4x256xf32>
    %73 = arith.mulf %70, %72 : vector<4x256xf32>
    %74 = arith.addf %63, %73 : vector<4x256xf32>
    %c0_47 = arith.constant 0 : index
    %c15 = arith.constant 15 : index
    %75 = vector.load %arg3[%c0_47, %c15] : memref<4x18xf32, #tpu.memory_space<vmem>>, vector<4x1xf32>
    %76 = vector.broadcast %75 : vector<4x1xf32> to vector<4x256xf32>
    %77 = arith.mulf %70, %76 : vector<4x256xf32>
    %78 = arith.addf %67, %77 : vector<4x256xf32>
    %c0_48 = arith.constant 0 : index
    %c1_49 = arith.constant 1 : index
    %c0_50 = arith.constant 0 : index
    %c0_51 = arith.constant 0 : index
    %c32_52 = arith.constant 32 : index
    %79 = vector.load %arg2[%c0_48, %c1_49, %c0_50, %c0_51, %c32_52] : memref<1x3x1x4x288xbf16, #tpu.memory_space<vmem>>, vector<1x1x1x4x256xbf16>
    %80 = vector.shape_cast %79 : vector<1x1x1x4x256xbf16> to vector<4x256xbf16>
    %81 = arith.extf %80 : vector<4x256xbf16> to vector<4x256xf32>
    %c0_53 = arith.constant 0 : index
    %c7 = arith.constant 7 : index
    %82 = vector.load %arg3[%c0_53, %c7] : memref<4x18xf32, #tpu.memory_space<vmem>>, vector<4x1xf32>
    %83 = vector.broadcast %82 : vector<4x1xf32> to vector<4x256xf32>
    %84 = arith.mulf %81, %83 : vector<4x256xf32>
    %85 = arith.addf %74, %84 : vector<4x256xf32>
    %c0_54 = arith.constant 0 : index
    %c16_55 = arith.constant 16 : index
    %86 = vector.load %arg3[%c0_54, %c16_55] : memref<4x18xf32, #tpu.memory_space<vmem>>, vector<4x1xf32>
    %87 = vector.broadcast %86 : vector<4x1xf32> to vector<4x256xf32>
    %88 = arith.mulf %81, %87 : vector<4x256xf32>
    %89 = arith.addf %78, %88 : vector<4x256xf32>
    %c0_56 = arith.constant 0 : index
    %c2_57 = arith.constant 2 : index
    %c0_58 = arith.constant 0 : index
    %c0_59 = arith.constant 0 : index
    %c32_60 = arith.constant 32 : index
    %90 = vector.load %arg2[%c0_56, %c2_57, %c0_58, %c0_59, %c32_60] : memref<1x3x1x4x288xbf16, #tpu.memory_space<vmem>>, vector<1x1x1x4x256xbf16>
    %91 = vector.shape_cast %90 : vector<1x1x1x4x256xbf16> to vector<4x256xbf16>
    %92 = arith.extf %91 : vector<4x256xbf16> to vector<4x256xf32>
    %c0_61 = arith.constant 0 : index
    %c8 = arith.constant 8 : index
    %93 = vector.load %arg3[%c0_61, %c8] : memref<4x18xf32, #tpu.memory_space<vmem>>, vector<4x1xf32>
    %94 = vector.broadcast %93 : vector<4x1xf32> to vector<4x256xf32>
    %95 = arith.mulf %92, %94 : vector<4x256xf32>
    %96 = arith.addf %85, %95 : vector<4x256xf32>
    %c0_62 = arith.constant 0 : index
    %c17 = arith.constant 17 : index
    %97 = vector.load %arg3[%c0_62, %c17] : memref<4x18xf32, #tpu.memory_space<vmem>>, vector<4x1xf32>
    %98 = vector.broadcast %97 : vector<4x1xf32> to vector<4x256xf32>
    %99 = arith.mulf %92, %98 : vector<4x256xf32>
    %100 = arith.addf %89, %99 : vector<4x256xf32>
    %c0_63 = arith.constant 0 : index
    %c0_64 = arith.constant 0 : index
    %101 = vector.load %arg4[%c0_63, %c0_64] : memref<4x2xf32, #tpu.memory_space<vmem>>, vector<4x1xf32>
    %102 = vector.broadcast %101 : vector<4x1xf32> to vector<4x256xf32>
    %103 = arith.addf %96, %102 : vector<4x256xf32>
    %c0_65 = arith.constant 0 : index
    %c1_66 = arith.constant 1 : index
    %104 = vector.load %arg4[%c0_65, %c1_66] : memref<4x2xf32, #tpu.memory_space<vmem>>, vector<4x1xf32>
    %105 = vector.broadcast %104 : vector<4x1xf32> to vector<4x256xf32>
    %106 = arith.addf %100, %105 : vector<4x256xf32>
    %cst_67 = arith.constant dense<0.000000e+00> : vector<256xf32>
    %107 = vector.multi_reduction <add>, %103, %cst_67 [0] : vector<4x256xf32> to vector<256xf32>
    %108 = vector.shape_cast %107 : vector<256xf32> to vector<1x256xf32>
    %cst_68 = arith.constant dense<0.000000e+00> : vector<256xf32>
    %109 = vector.multi_reduction <add>, %106, %cst_68 [0] : vector<4x256xf32> to vector<256xf32>
    %110 = vector.shape_cast %109 : vector<256xf32> to vector<1x256xf32>
    %111 = arith.addf %108, %110 : vector<1x256xf32>
    %cst_69 = arith.constant 1.250000e-01 : f32
    %112 = vector.broadcast %cst_69 : f32 to vector<1x256xf32>
    %113 = arith.mulf %111, %112 : vector<1x256xf32>
    %114 = vector.broadcast %113 : vector<1x256xf32> to vector<4x256xf32>
    %115 = arith.subf %103, %114 : vector<4x256xf32>
    %116 = vector.broadcast %113 : vector<1x256xf32> to vector<4x256xf32>
    %117 = arith.subf %106, %116 : vector<4x256xf32>
    %118 = arith.mulf %115, %115 : vector<4x256xf32>
    %cst_70 = arith.constant dense<0.000000e+00> : vector<256xf32>
    %119 = vector.multi_reduction <add>, %118, %cst_70 [0] : vector<4x256xf32> to vector<256xf32>
    %120 = vector.shape_cast %119 : vector<256xf32> to vector<1x256xf32>
    %121 = arith.mulf %117, %117 : vector<4x256xf32>
    %cst_71 = arith.constant dense<0.000000e+00> : vector<256xf32>
    %122 = vector.multi_reduction <add>, %121, %cst_71 [0] : vector<4x256xf32> to vector<256xf32>
    %123 = vector.shape_cast %122 : vector<256xf32> to vector<1x256xf32>
    %124 = arith.addf %120, %123 : vector<1x256xf32>
    %cst_72 = arith.constant 1.250000e-01 : f32
    %125 = vector.broadcast %cst_72 : f32 to vector<1x256xf32>
    %126 = arith.mulf %124, %125 : vector<1x256xf32>
    %cst_73 = arith.constant 9.99999997E-7 : f32
    %127 = vector.broadcast %cst_73 : f32 to vector<1x256xf32>
    %128 = arith.addf %126, %127 : vector<1x256xf32>
    %129 = math.rsqrt %128 : vector<1x256xf32>
    %130 = vector.broadcast %129 : vector<1x256xf32> to vector<4x256xf32>
    %131 = arith.mulf %115, %130 : vector<4x256xf32>
    %c0_74 = arith.constant 0 : index
    %c0_75 = arith.constant 0 : index
    %132 = vector.load %arg5[%c0_74, %c0_75] : memref<4x2xf32, #tpu.memory_space<vmem>>, vector<4x1xf32>
    %133 = vector.broadcast %132 : vector<4x1xf32> to vector<4x256xf32>
    %134 = arith.mulf %131, %133 : vector<4x256xf32>
    %c0_76 = arith.constant 0 : index
    %c0_77 = arith.constant 0 : index
    %135 = vector.load %arg6[%c0_76, %c0_77] : memref<4x2xf32, #tpu.memory_space<vmem>>, vector<4x1xf32>
    %136 = vector.broadcast %135 : vector<4x1xf32> to vector<4x256xf32>
    %137 = arith.addf %134, %136 : vector<4x256xf32>
    %138 = vector.broadcast %129 : vector<1x256xf32> to vector<4x256xf32>
    %139 = arith.mulf %117, %138 : vector<4x256xf32>
    %c0_78 = arith.constant 0 : index
    %c1_79 = arith.constant 1 : index
    %140 = vector.load %arg5[%c0_78, %c1_79] : memref<4x2xf32, #tpu.memory_space<vmem>>, vector<4x1xf32>
    %141 = vector.broadcast %140 : vector<4x1xf32> to vector<4x256xf32>
    %142 = arith.mulf %139, %141 : vector<4x256xf32>
    %c0_80 = arith.constant 0 : index
    %c1_81 = arith.constant 1 : index
    %143 = vector.load %arg6[%c0_80, %c1_81] : memref<4x2xf32, #tpu.memory_space<vmem>>, vector<4x1xf32>
    %144 = vector.broadcast %143 : vector<4x1xf32> to vector<4x256xf32>
    %145 = arith.addf %142, %144 : vector<4x256xf32>
    %cst_82 = arith.constant 0.000000e+00 : f32
    %146 = vector.broadcast %cst_82 : f32 to vector<4x256xf32>
    %c0_83 = arith.constant 0 : index
    %c0_84 = arith.constant 0 : index
    %147 = vector.load %arg8[%c0_83, %c0_84] : memref<4x1xf32, #tpu.memory_space<vmem>>, vector<4x1xf32>
    %148 = vector.broadcast %147 : vector<4x1xf32> to vector<4x256xf32>
    %149 = arith.addf %146, %148 : vector<4x256xf32>
    %150 = vector.extract_strided_slice %137 {offsets = [0, 0], sizes = [1, 256], strides = [1, 1]} : vector<4x256xf32> to vector<1x256xf32>
    %c0_85 = arith.constant 0 : index
    %c0_86 = arith.constant 0 : index
    %151 = vector.load %arg7[%c0_85, %c0_86] : memref<4x8xf32, #tpu.memory_space<vmem>>, vector<4x1xf32>
    %152 = vector.broadcast %150 : vector<1x256xf32> to vector<4x256xf32>
    %153 = vector.broadcast %151 : vector<4x1xf32> to vector<4x256xf32>
    %154 = arith.mulf %152, %153 : vector<4x256xf32>
    %155 = arith.addf %149, %154 : vector<4x256xf32>
    %156 = vector.extract_strided_slice %137 {offsets = [1, 0], sizes = [1, 256], strides = [1, 1]} : vector<4x256xf32> to vector<1x256xf32>
    %c0_87 = arith.constant 0 : index
    %c2_88 = arith.constant 2 : index
    %157 = vector.load %arg7[%c0_87, %c2_88] : memref<4x8xf32, #tpu.memory_space<vmem>>, vector<4x1xf32>
    %158 = vector.broadcast %156 : vector<1x256xf32> to vector<4x256xf32>
    %159 = vector.broadcast %157 : vector<4x1xf32> to vector<4x256xf32>
    %160 = arith.mulf %158, %159 : vector<4x256xf32>
    %161 = arith.addf %155, %160 : vector<4x256xf32>
    %162 = vector.extract_strided_slice %137 {offsets = [2, 0], sizes = [1, 256], strides = [1, 1]} : vector<4x256xf32> to vector<1x256xf32>
    %c0_89 = arith.constant 0 : index
    %c4_90 = arith.constant 4 : index
    %163 = vector.load %arg7[%c0_89, %c4_90] : memref<4x8xf32, #tpu.memory_space<vmem>>, vector<4x1xf32>
    %164 = vector.broadcast %162 : vector<1x256xf32> to vector<4x256xf32>
    %165 = vector.broadcast %163 : vector<4x1xf32> to vector<4x256xf32>
    %166 = arith.mulf %164, %165 : vector<4x256xf32>
    %167 = arith.addf %161, %166 : vector<4x256xf32>
    %168 = vector.extract_strided_slice %137 {offsets = [3, 0], sizes = [1, 256], strides = [1, 1]} : vector<4x256xf32> to vector<1x256xf32>
    %c0_91 = arith.constant 0 : index
    %c6_92 = arith.constant 6 : index
    %169 = vector.load %arg7[%c0_91, %c6_92] : memref<4x8xf32, #tpu.memory_space<vmem>>, vector<4x1xf32>
    %170 = vector.broadcast %168 : vector<1x256xf32> to vector<4x256xf32>
    %171 = vector.broadcast %169 : vector<4x1xf32> to vector<4x256xf32>
    %172 = arith.mulf %170, %171 : vector<4x256xf32>
    %173 = arith.addf %167, %172 : vector<4x256xf32>
    %174 = vector.extract_strided_slice %145 {offsets = [0, 0], sizes = [1, 256], strides = [1, 1]} : vector<4x256xf32> to vector<1x256xf32>
    %c0_93 = arith.constant 0 : index
    %c1_94 = arith.constant 1 : index
    %175 = vector.load %arg7[%c0_93, %c1_94] : memref<4x8xf32, #tpu.memory_space<vmem>>, vector<4x1xf32>
    %176 = vector.broadcast %174 : vector<1x256xf32> to vector<4x256xf32>
    %177 = vector.broadcast %175 : vector<4x1xf32> to vector<4x256xf32>
    %178 = arith.mulf %176, %177 : vector<4x256xf32>
    %179 = arith.addf %173, %178 : vector<4x256xf32>
    %180 = vector.extract_strided_slice %145 {offsets = [1, 0], sizes = [1, 256], strides = [1, 1]} : vector<4x256xf32> to vector<1x256xf32>
    %c0_95 = arith.constant 0 : index
    %c3_96 = arith.constant 3 : index
    %181 = vector.load %arg7[%c0_95, %c3_96] : memref<4x8xf32, #tpu.memory_space<vmem>>, vector<4x1xf32>
    %182 = vector.broadcast %180 : vector<1x256xf32> to vector<4x256xf32>
    %183 = vector.broadcast %181 : vector<4x1xf32> to vector<4x256xf32>
    %184 = arith.mulf %182, %183 : vector<4x256xf32>
    %185 = arith.addf %179, %184 : vector<4x256xf32>
    %186 = vector.extract_strided_slice %145 {offsets = [2, 0], sizes = [1, 256], strides = [1, 1]} : vector<4x256xf32> to vector<1x256xf32>
    %c0_97 = arith.constant 0 : index
    %c5_98 = arith.constant 5 : index
    %187 = vector.load %arg7[%c0_97, %c5_98] : memref<4x8xf32, #tpu.memory_space<vmem>>, vector<4x1xf32>
    %188 = vector.broadcast %186 : vector<1x256xf32> to vector<4x256xf32>
    %189 = vector.broadcast %187 : vector<4x1xf32> to vector<4x256xf32>
    %190 = arith.mulf %188, %189 : vector<4x256xf32>
    %191 = arith.addf %185, %190 : vector<4x256xf32>
    %192 = vector.extract_strided_slice %145 {offsets = [3, 0], sizes = [1, 256], strides = [1, 1]} : vector<4x256xf32> to vector<1x256xf32>
    %c0_99 = arith.constant 0 : index
    %c7_100 = arith.constant 7 : index
    %193 = vector.load %arg7[%c0_99, %c7_100] : memref<4x8xf32, #tpu.memory_space<vmem>>, vector<4x1xf32>
    %194 = vector.broadcast %192 : vector<1x256xf32> to vector<4x256xf32>
    %195 = vector.broadcast %193 : vector<4x1xf32> to vector<4x256xf32>
    %196 = arith.mulf %194, %195 : vector<4x256xf32>
    %197 = arith.addf %191, %196 : vector<4x256xf32>
    %c0_101 = arith.constant 0 : index
    %c1_102 = arith.constant 1 : index
    %c0_103 = arith.constant 0 : index
    %c0_104 = arith.constant 0 : index
    %c16_105 = arith.constant 16 : index
    %198 = vector.load %arg2[%c0_101, %c1_102, %c0_103, %c0_104, %c16_105] : memref<1x3x1x4x288xbf16, #tpu.memory_space<vmem>>, vector<1x1x1x4x256xbf16>
    %199 = vector.shape_cast %198 : vector<1x1x1x4x256xbf16> to vector<4x256xbf16>
    %200 = arith.extf %199 : vector<4x256xbf16> to vector<4x256xf32>
    %201 = arith.addf %197, %200 : vector<4x256xf32>
    %cst_106 = arith.constant 0.000000e+00 : f32
    %202 = vector.broadcast %cst_106 : f32 to vector<4x256xf32>
    %203 = arith.maximumf %201, %202 : vector<4x256xf32>
    %c0_107 = arith.constant 0 : index
    %c0_108 = arith.constant 0 : index
    %c0_109 = arith.constant 0 : index
    %c0_110 = arith.constant 0 : index
    %204 = vector.load %arg9[%c0_107, %c0_108, %c0_109, %c0_110] : memref<1x1x4x256xf32, #tpu.memory_space<vmem>>, vector<1x1x4x256xf32>
    %205 = vector.shape_cast %204 : vector<1x1x4x256xf32> to vector<4x256xf32>
    %206 = vector.shape_cast %203 : vector<4x256xf32> to vector<1x1x4x256xf32>
    tpu.vector_store %arg9[%c0_107, %c0_108, %c0_109, %c0_110], %206 {strides = array<i32>} : memref<1x1x4x256xf32, #tpu.memory_space<vmem>>, vector<1x1x4x256xf32>,
    return
  }
  func.func @transform_0(%arg0: i32, %arg1: i32) -> (i32, i32, i32, i32, i32) {
    %c0_i32 = arith.constant 0 : i32
    %c0_i32_0 = arith.constant 0 : i32
    %c0_i32_1 = arith.constant 0 : i32
    %c0_i32_2 = arith.constant 0 : i32
    return %arg0, %c0_i32, %arg1, %c0_i32_0, %c0_i32_1 : i32, i32, i32, i32, i32
  }
  func.func @transform_1(%arg0: i32, %arg1: i32) -> (i32, i32) {
    %c0_i32 = arith.constant 0 : i32
    %c0_i32_0 = arith.constant 0 : i32
    %c0_i32_1 = arith.constant 0 : i32
    return %c0_i32, %c0_i32_0 : i32, i32
  }
  func.func @transform_2(%arg0: i32, %arg1: i32) -> (i32, i32) {
    %c0_i32 = arith.constant 0 : i32
    %c0_i32_0 = arith.constant 0 : i32
    %c0_i32_1 = arith.constant 0 : i32
    return %c0_i32, %c0_i32_0 : i32, i32
  }
  func.func @transform_3(%arg0: i32, %arg1: i32) -> (i32, i32) {
    %c0_i32 = arith.constant 0 : i32
    %c0_i32_0 = arith.constant 0 : i32
    %c0_i32_1 = arith.constant 0 : i32
    return %c0_i32, %c0_i32_0 : i32, i32
  }
  func.func @transform_4(%arg0: i32, %arg1: i32) -> (i32, i32) {
    %c0_i32 = arith.constant 0 : i32
    %c0_i32_0 = arith.constant 0 : i32
    %c0_i32_1 = arith.constant 0 : i32
    return %c0_i32, %c0_i32_0 : i32, i32
  }
  func.func @transform_5(%arg0: i32, %arg1: i32) -> (i32, i32) {
    %c0_i32 = arith.constant 0 : i32
    %c0_i32_0 = arith.constant 0 : i32
    %c0_i32_1 = arith.constant 0 : i32
    return %c0_i32, %c0_i32_0 : i32, i32
  }
  func.func @transform_6(%arg0: i32, %arg1: i32) -> (i32, i32) {
    %c0_i32 = arith.constant 0 : i32
    %c0_i32_0 = arith.constant 0 : i32
    %c0_i32_1 = arith.constant 0 : i32
    return %c0_i32, %c0_i32_0 : i32, i32
  }
  func.func @transform_7(%arg0: i32, %arg1: i32) -> (i32, i32, i32, i32) {
    %c0_i32 = arith.constant 0 : i32
    %c0_i32_0 = arith.constant 0 : i32
    %c0_i32_1 = arith.constant 0 : i32
    return %arg0, %arg1, %c0_i32, %c0_i32_0 : i32, i32, i32, i32
  }
}

</mosaic_0001>

<bundles_post_ra>
// kernel: tpu_custom_call.1
= control target key start
LH: loop header
LB: loop body
LE: loop exit
PB: predicated region body
PF: predicated region fallthrough
CT: control target
= control target key end

     0   :  { %12 = vsyncpa [#allocation3], 0  ;;  %s1938_s0 = inlined_call_operand.hbm [shape: bf16[2,3,1,4,288], index: 0, kind: input, shape index: {}]   ;;  %s1939_s1 = inlined_call_operand.vmem [shape: f32[4,18], index: 1, kind: input, shape index: {}]   ;;  %s1940_s2 = inlined_call_operand.vmem [shape: f32[4,2], index: 2, kind: input, shape index: {}]   ;;  %s1941_s3 = inlined_call_operand.vmem [shape: f32[4,2], index: 3, kind: input, shape index: {}]   ;;  %s1942_s4 = inlined_call_operand.vmem [shape: f32[4,2], index: 4, kind: input, shape index: {}]   ;;  %s1943_s5 = inlined_call_operand.vmem [shape: f32[4,8], index: 5, kind: input, shape index: {}]   ;;  %s1944_s6 = inlined_call_operand.vmem [shape: f32[4,1], index: 6, kind: input, shape index: {}]   ;;  %s1945_s7 = inlined_call_operand.hbm [shape: f32[2,1,4,256], index: 7, kind: output, shape index: {}]  }
   0x1   :  { %14 = vsyncpa [#allocation3 + $0x1], 0 }
   0x2   :  { %15 = vsyncpa [#allocation4], 0 }
   0x3   :  { %17 = vsyncpa [#allocation4 + $0x1], 0  ;;  %s1557_s24 = smov 0   ;;  %s1559_s25 = smov 0  }
   0x4   :  { %s1561_s26 = smov 0   ;;  %s1563_s27 = smov 0  }
   0x5   :  { %s1565_s28 = smov 0   ;;  %s1567_s29 = smov 0  }
   0x6 LB: > { %s1233_s30 = sadd.s32 4294967295, %s1490_s29   ;;  %s1234_s8 = sadd.s32 4294967294, %s1490_s29   ;;  %s1490_s29 = sphi %s1567_s29, %s23_s29   ;;  %s1486_s28 = sphi %s1565_s28, %s1960_s28   ;;  %s1482_s27 = sphi %s1563_s27, %s1959_s27   ;;  %s1478_s26 = sphi %s1561_s26, %s1958_s26   ;;  %s1474_s25 = sphi %s1559_s25, %s1957_s25   ;;  %s1470_s24 = sphi %s1557_s24, %s1956_s24  }
   0x7   : > { %s35_s9 = sadd.s32 1, %s1486_s28  ;;  %s44_s10 = sadd.s32 1, %s1478_s26 }
   0x8   : > { %p37_p0 = scmp.ge.s32.totalorder %s35_s9, 2  ;;  %p51_p1 = scmp.ne.s32.totalorder %s1478_s26, %s1474_s25 }
   0x9   : > { %p52_p2 = scmp.eq.s32.totalorder %s1490_s29, 0  ;;  %p57_p3 = scmp.ne.s32.totalorder %s1474_s25, %s1470_s24 }
   0xa   : > { %s1962_s9 = smov (%p37_p0, %s35_s9), 0  ;;  %p58_p5 = scmp.eq.s32.totalorder %s1233_s30, 0 }
   0xb   : > { %p1598_p4 = por %p52_p2, %p51_p1  ;;  %s39_s12 = ssub.s32 %s1486_s28, %s1962_s9 }
   0xc   : > { %p209_p6 = scmp.eq.s32.totalorder %s1233_s30, 1  ;;  %p42_p7 = scmp.eq.s32.totalorder %s39_s12, 0 }
   0xd   : > { %p1604_p8 = por %p58_p5, %p57_p3  ;;  %p215_p10 = scmp.eq.s32.totalorder %s1234_s8, 1 }
   0xe   : > { %p1608_p9 = por %p209_p6, %p51_p1  ;;  %p1265_p13 = scmp.lt.s32.totalorder %s1490_s29, 2 }
   0xf   : > { %s1613_s15 = scalar_select %p42_p7, %s1478_s26, %s44_s10  }
  0x10   : > { %s1949_s14 = scalar_select %p1608_p9, 1, 0 }
  0x11   : > { %p1615_p11 = por %p215_p10, %p57_p3  ;;  %s253_s17 = sand.u32 1, %s1478_s26  }
  0x12   : > { %s1250_s18 = smul.u32 18, %s253_s17  ;;  %p1625_p0 = pnand %p1265_p13, %p1598_p4 }
  0x13   : > { %s1950_s16 = scalar_select %p1615_p11, 1, 0 }
  0x14   : > { %s1251_s19 = smul.u32 288, %s1486_s28  ;;  %s257_s30 = scalar_lea.vmem [#allocation2], %s1250_s18 }
  0x15   : > { %s266_s8 = sshll.u32 %s257_s30, 4  ;;  %s1637_s10 = scalar_lea.sflag [#allocation3], %s253_s17  ;;  %s1634_s8 = int_to_ptr.vmem [resolvable:$true] %s266_s8 }
  0x16   : > { %s1632_s23 = scalar_lea.hbm %s1938_s0, %s1251_s19  ;;  %p1380_p3 = pneg %p1625_p0 }
  0x17   : > { %s1378_s11 = scalar_lea.hbm %s1632_s23, 288  ;;  %s1383_s21 = scalar_lea.hbm %s1938_s0, 576 }
  0x18   : > { %p1379_p2 = scmp.ne.s32.totalorder %s1632_s23, %s1378_s11  ;;  %p1384_p6 = scmp.lt.u32.totalorder %s1632_s23, %s1938_s0 }
  0x19   : > { %p1385_p7 = scmp.lt.u32.totalorder %s1383_s21, %s1378_s11  ;;  %p1387_p13 = scmp.lt.u32.totalorder %s1378_s11, %s1632_s23 }
  0x1a   : > { %p1381_p4 = pnand %p1380_p3, %p1379_p2 }
  0x1b   : > { %p1386_p10 = por %p1385_p7, %p1384_p6 }
  0x1c   : > { %p1382_p5 = pneg %p1381_p4 }
  0x1d   : > { %p1388_p12 = por %p1387_p13, %p1386_p10 }
  0x1f   : > { %p1389_p1 = pnand %p1388_p12, %p1382_p5 }
  0x21   : > { %1392 = shalt.err (!%p1389_p1)
}
  0x22   : > { %s1393_s17 = scalar_lea.vmem %s1634_s8, 288  ;;  %s1492_s30 = smov [#allocation2]  }
  0x23   : > { %p1394_p2 = scmp.ne.s32.totalorder %s1634_s8, %s1393_s17  ;;  %s1398_s12 = sshll.u32 %s1492_s30, 4  ;;  %s1399_s12 = int_to_ptr.vmem [resolvable:$false] %s1398_s12 }
  0x24   : > { %s1400_s19 = scalar_lea.vmem %s1399_s12, 576  ;;  %p1401_p9 = scmp.lt.s32.totalorder %s1634_s8, %s1399_s12 }
  0x25   : > { %p1396_p4 = pnand %p1394_p2, %p1380_p3  ;;  %p1402_p6 = scmp.lt.s32.totalorder %s1400_s19, %s1393_s17 }
  0x27   : > { %p1397_p11 = pneg %p1396_p4  ;;  %p1403_p7 = por %p1402_p6, %p1401_p9 }
  0x29   : > { %p1404_p10 = pnand %p1403_p7, %p1397_p11 }
  0x2b   : > { %1407 = shalt.err (!%p1404_p10)
}
  0x2c   : > { %s1493_s11 = smov 96   ;;  %s1494_s21 = smov 6  }
  0x2d   : > { %1260 = dma.hbm_to_vmem [thread:$0]  (!%p1625_p0), %s1632_s23, 288, %s1634_s8, %s1637_s10, %s1493_s11, %s1493_s11, %s1494_s21  }
  0x2e   : > { %p274_p12 = scmp.lt.s32.totalorder %s1490_s29, 3  ;;  %p1952_p1 = scmp.ge.s32.totalorder %s1490_s29, 1 }
  0x30   : > { %p275_p3 = pnand %p1952_p1, %p274_p12 }
  0x31   : > { %s1669_s22 = sand.u32 (!%p275_p3), 1, %s1474_s25  }
  0x32   : > { %278 = sbr.rel (%p275_p3) target bundleno = 470 (0x1d6), region = 48  ;;  %s281_s17 = scalar_lea.sflag (!%p275_p3), [#allocation3], %s1669_s22 }
  0x33   : > { %s1252_s18 = smul.u32 (!%p275_p3), 18, %s1669_s22 }
  0x35   : > { %s1673_s30 = scalar_lea.vmem (!%p275_p3), [#allocation2], %s1252_s18 }
  0x39   : > { %1461 = dma.done.wait (%p1604_p8), %s281_s17, 288  }
  0x3a   : > { %1463 = vsyncadd (%p1604_p8), %s281_s17, 4294967008  ;;  %v1495_v0 = vmov 3   ;;  %v1496_v1 = vmov 4   ;;  %v317_v2 = vld [vmem:[%s1939_s1] sm:$0xf]  ;;  %v1497_v3 = vmov 12   ;;  %v325_v22 = vlaneseq }
  0x3b   : > { %1338 = vset.pattern.permute.xlu0 %v1495_v0  ;;  %1340 = vset.pattern.permute.xlu1 %v1496_v1  ;;  %v1498_v4 = vmov 13   ;;  %v1499_v5 = vmov 5   ;;  %v1500_v6 = vmov 14   ;;  %v1501_v7 = vmov 6   ;;  %v715_v16 = vld [vmem:[%s1940_s2] sm:$0xf] }
  0x3c   : > { %407 = vperm.xlu0 %1338, %v317_v2   ;;  %462 = vperm.xlu1 %1340, %v317_v2   ;;  %v1502_v8 = vmov 7   ;;  %v1503_v9 = vmov 15   ;;  %v1504_v10 = vmov 17   ;;  %v1505_v11 = vmov 16   ;;  %v403_v25 = vld [vmem:[%s1673_s30] sm:$0x3f] }
  0x3d   : > { %v1506_v12 = vmov 1   ;;  %v1507_v13 = vmov 8   ;;  %v1508_v14 = vmov 11   ;;  %v1509_v15 = vmov 0   ;;  %v1242_v33 = vld [vmem:[%s1673_s30 + $0x6] sm:$0x3f] }
  0x3e   : > { %v1510_v17 = vmov 9   ;;  %v1511_v18 = vmov 10   ;;  %v1512_v19 = vmov 2   ;;  %v1513_v20 = vmov 839922192   ;;  %s1514_s10 = smov 112  }
  0x3f   : > { %v323_v21 = vunpack.c.l.s4 %v1513_v20  ;;  %v1696_v24 = vshrl.u32 %v325_v22, 7  ;;  %v404_v27 = vunpack.c.l.bf16 %v403_v25  ;;  %v405_v31 = vunpack.c.h.bf16 %v403_v25  ;;  %v1243_v45 = vld [vmem:[%s1673_s30 + $0xc] sm:$0x3f]  ;;  %s1515_s12 = smov 96   ;;  %s1133_s13 = scalar_lea.sflag [#allocation4], %s1669_s22 }
  0x40   : > { %1339 = vset.pattern.permute.xlu0 %v1497_v3  ;;  %1341 = vset.pattern.permute.xlu1 %v1498_v4  ;;  %v1706_v37 = vunpack.c.l.bf16 %v1242_v33  ;;  %v1713_v44 = vunpack.c.h.bf16 %v1242_v33  ;;  %v512_v48 = vunpack.c.l.bf16 %v1243_v45  ;;  %v513_v53 = vunpack.c.h.bf16 %v1243_v45  ;;  %v898_v33 = vld [vmem:[%s1943_s5] sm:$0xf]  ;;  %p1953_p9 = scmp.ne.s32.totalorder %s1949_s14, 0 }
  0x41   : > { %434 = vperm.xlu0 %1339, %v317_v2   ;;  %487 = vperm.xlu1 %1341, %v317_v2   ;;  %v324_v23 = vunpack.c.0.s8 %v323_v21  ;;  %vm427_vm0 = vcmask 1043456   ;;  %vm429_vm1 = vcmask 916480   ;;  %vm586_vm2 = vcmask 785408  }
  0x43   : > { %v1700_v26 = vsub.s32 %v324_v23, %v1696_v24 }
  0x45   : > { %1342 = vset.pattern.permute.xlu1 %v1499_v5  ;;  %1343 = vset.pattern.permute.xlu0 %v1500_v6 }
  0x46   : > { %515 = vperm.xlu1 %1342, %v317_v2   ;;  %540 = vperm.xlu0 %1343, %v317_v2  }
  0x4a   : > { %1344 = vset.pattern.permute.xlu1 %v1501_v7  ;;  %1346 = vset.pattern.permute.xlu0 %v1502_v8 }
  0x4b   : > { %565 = vperm.xlu1 %1344, %v317_v2   ;;  %616 = vperm.xlu0 %1346, %v317_v2  }
  0x4f   : > { %1345 = vset.pattern.permute.xlu1 %v1503_v9  ;;  %1349 = vset.pattern.permute.xlu0 %v1504_v10 }
  0x50   : > { %591 = vperm.xlu1 %1345, %v317_v2   ;;  %691 = vperm.xlu0 %1349, %v317_v2  }
  0x54   : > { %1347 = vset.pattern.permute.xlu1 %v1505_v11  ;;  %1352 = vset.pattern.permute.xlu0 %v1506_v12 }
  0x55   : > { %641 = vperm.xlu1 %1347, %v317_v2   ;;  %349 = vperm.xlu0 %1352, %v317_v2  }
  0x59   : > { %1348 = vset.pattern.permute.xlu1 %v1507_v13  ;;  %1355 = vset.pattern.permute.xlu0 %v1508_v14 }
  0x5a   : > { %666 = vperm.xlu1 %1348, %v317_v2   ;;  %391 = vperm.xlu0 %1355, %v317_v2  }
  0x5e   : > { %1350 = vset.pattern.permute.xlu1 %v1509_v15  ;;  %1356 = vset.pattern.permute.xlu0 %v1509_v15 }
  0x5f   : > { %320 = vperm.xlu1 %1350, %v317_v2   ;;  %718 = vperm.xlu0 %1356, %v715_v16  }
  0x63   : > { %1351 = vset.pattern.permute.xlu1 %v1510_v17 }
  0x64   : > { %333 = vperm.xlu1 %1351, %v317_v2  }
  0x68   : > { %1353 = vset.pattern.permute.xlu1 %v1511_v18 }
  0x69   : > { %362 = vperm.xlu1 %1353, %v317_v2  }
  0x6d   : > { %1354 = vset.pattern.permute.xlu1 %v1512_v19 }
  0x6e   : > { %378 = vperm.xlu1 %1354, %v317_v2  }
  0x72   : > { %1357 = vset.pattern.permute.xlu1 %v1506_v12 }
  0x73   : > { %730 = vperm.xlu1 %1357, %v715_v16  }
  0x77   : > { %1358 = vset.pattern.permute.xlu1 %v1509_v15 }
  0xbb   : > { %v408_v28 = vpop.permute.xlu0 %407  ;;  %v463_v29 = vpop.permute.xlu1 %462 }
  0xbc   : > { %v415_v30 = vrot.slane %v408_v28, %v1700_v26  ;;  %v470_v38 = vrot.slane %v463_v29, %v1700_v26  ;;  %v848_v29 = vld [vmem:[%s1942_s4] sm:$0xf] }
  0xbe   : > { %v417_v32 = vmul.f32 %v415_v30, %v404_v27  ;;  %v418_v39 = vmul.f32 %v415_v30, %v405_v31  ;;  %v472_v42 = vmul.f32 %v470_v38, %v1706_v37  ;;  %v473_v50 = vmul.f32 %v470_v38, %v1713_v44  ;;  %v834_v30 = vld [vmem:[%s1941_s3] sm:$0xf] }
  0xc0   : > { %421 = vrot.lane.b32.xlu1 %v417_v32, %s1514_s10  ;;  %v435_v34 = vpop.permute.xlu0 %434  ;;  %v488_v35 = vpop.permute.xlu1 %487  ;;  %v863_v32 = vld [vmem:[%s1941_s3] sm:$0xf] }
  0xc1   : > { %v442_v36 = vrot.slane %v435_v34, %v1700_v26  ;;  %v495_v43 = vrot.slane %v488_v35, %v1700_v26  ;;  %v891_v34 = vld [vmem:[%s1944_s6] sm:$0xf] }
  0xc3   : > { %v444_v40 = vmul.f32 %v442_v36, %v404_v27  ;;  %v445_v41 = vmul.f32 %v442_v36, %v405_v31  ;;  %v497_v47 = vmul.f32 %v495_v43, %v1706_v37  ;;  %v498_v52 = vmul.f32 %v495_v43, %v1713_v44 }
  0xc4   : > { %423 = vrot.lane.b32.xlu1 %v418_v39, %s1514_s10 }
  0xc5   : > { %448 = vrot.lane.b32.xlu0 %v444_v40, %s1514_s10  ;;  %v516_v46 = vpop.permute.xlu1 %515  ;;  %v541_v51 = vpop.permute.xlu0 %540 }
  0xc6   : > { %v523_v49 = vrot.slane %v516_v46, %v1700_v26  ;;  %v548_v56 = vrot.slane %v541_v51, %v1700_v26 }
  0xc8   : > { %450 = vrot.lane.b32.xlu1 %v445_v41, %s1514_s10  ;;  %v525_v55 = vmul.f32 %v523_v49, %v512_v48  ;;  %v526_v57 = vmul.f32 %v523_v49, %v513_v53  ;;  %v550_v58 = vmul.f32 %v548_v56, %v512_v48  ;;  %v551_v61 = vmul.f32 %v548_v56, %v513_v53 }
  0xc9   : > { %476 = vrot.lane.b32.xlu0 %v472_v42, %s1514_s10 }
  0xca   : > { %v566_v54 = vpop.permute.xlu1 %565  ;;  %v617_v2 = vpop.permute.xlu0 %616 }
  0xcb   : > { %v573_v59 = vrot.slane %v566_v54, %v1700_v26  ;;  %v624_v9 = vrot.slane %v617_v2, %v1700_v26 }
  0xcc   : > { %478 = vrot.lane.b32.xlu1 %v473_v50, %s1514_s10 }
  0xcd   : > { %501 = vrot.lane.b32.xlu0 %v497_v47, %s1514_s10  ;;  %v575_v62 = vmul.f32 %v573_v59, %v404_v27  ;;  %v576_v3 = vmul.f32 %v573_v59, %v405_v31  ;;  %v627_v11 = vmul.f32 %v624_v9, %v1713_v44  ;;  %v626_v16 = vmul.f32 %v624_v9, %v1706_v37  ;;  %v315_v47 = vld [vmem:[%s1673_s30] ss:$6 sps:$4 sm:$0xff]  }
  0xce   : > { %v316_v49 = vunpack.c.l.bf16 %v315_v47  ;;  %v347_v51 = vunpack.c.h.bf16 %v315_v47 }
  0xcf   : > { %v592_v60 = vpop.permute.xlu1 %591  ;;  %v692_v20 = vpop.permute.xlu0 %691 }
  0xd0   : > { %503 = vrot.lane.b32.xlu1 %v498_v52, %s1514_s10  ;;  %v599_v63 = vrot.slane %v592_v60, %v1700_v26  ;;  %v699_v23 = vrot.slane %v692_v20, %v1700_v26 }
  0xd1   : > { %529 = vrot.lane.b32.xlu0 %v525_v55, %s1514_s10 }
  0xd2   : > { %v601_v6 = vmul.f32 %v599_v63, %v404_v27  ;;  %v602_v10 = vmul.f32 %v599_v63, %v405_v31  ;;  %v702_v27 = vmul.f32 %v699_v23, %v513_v53  ;;  %v701_v28 = vmul.f32 %v699_v23, %v512_v48  ;;  %v877_v31 = vld [vmem:[%s1942_s4] sm:$0xf] }
  0xd4   : > { %531 = vrot.lane.b32.xlu1 %v526_v57, %s1514_s10  ;;  %v642_v4 = vpop.permute.xlu1 %641 }
  0xd5   : > { %554 = vrot.lane.b32.xlu0 %v550_v58, %s1514_s10  ;;  %v649_v13 = vrot.slane %v642_v4, %v1700_v26 }
  0xd7   : > { %v652_v17 = vmul.f32 %v649_v13, %v1713_v44  ;;  %v651_v21 = vmul.f32 %v649_v13, %v1706_v37 }
  0xd8   : > { %556 = vrot.lane.b32.xlu1 %v551_v61, %s1514_s10 }
  0xd9   : > { %579 = vrot.lane.b32.xlu0 %v575_v62, %s1515_s12  ;;  %v667_v14 = vpop.permute.xlu1 %666 }
  0xda   : > { %v674_v18 = vrot.slane %v667_v14, %v1700_v26 }
  0xdc   : > { %581 = vrot.lane.b32.xlu1 %v576_v3, %s1515_s12  ;;  %v677_v22 = vmul.f32 %v674_v18, %v513_v53  ;;  %v676_v25 = vmul.f32 %v674_v18, %v512_v48  ;;  %v1241_v53 = vld [vmem:[%s1673_s30 + $0xc] sm:$0xf]  ;;  %s1239_s30 = sshll.u32 %s1669_s22, 3 }
  0xdd   : > { %605 = vrot.lane.b32.xlu0 %v601_v6, %s1515_s12  ;;  %v376_v58 = vunpack.c.l.bf16 %v1241_v53  ;;  %s314_s21 = scalar_lea.vmem [#allocation5], %s1239_s30 }
  0xde   : > { %s1149_s18 = sshll.u32 %s314_s21, 4  ;;  %s1891_s18 = int_to_ptr.vmem [resolvable:$true] %s1149_s18 }
  0xdf   : > { %s1408_s8 = scalar_lea.vmem %s1891_s18, 128 }
  0xe0   : > { %607 = vrot.lane.b32.xlu1 %v602_v10, %s1515_s12  ;;  %p1409_p8 = scmp.ne.s32.totalorder %s1891_s18, %s1408_s8 }
  0xe1   : > { %632 = vrot.lane.b32.xlu0 %v627_v11, %s1515_s12 }
  0xe2   : > { %p1410_p11 = pnand %p1409_p8, %p1953_p9 }
  0xe4   : > { %630 = vrot.lane.b32.xlu1 %v626_v16, %s1515_s12  ;;  %p1411_p0 = pneg %p1410_p11 }
  0xe5   : > { %657 = vrot.lane.b32.xlu0 %v652_v17, %s1515_s12 }
  0xe8   : > { %655 = vrot.lane.b32.xlu1 %v651_v21, %s1515_s12 }
  0xe9   : > { %682 = vrot.lane.b32.xlu0 %v677_v22, %s1515_s12 }
  0xec   : > { %680 = vrot.lane.b32.xlu1 %v676_v25, %s1515_s12 }
  0xed   : > { %707 = vrot.lane.b32.xlu0 %v702_v27, %s1515_s12 }
  0xf0   : > { %705 = vrot.lane.b32.xlu1 %v701_v28, %s1515_s12 }
  0xf1   : > { %851 = vperm.xlu0 %1356, %v848_v29  }
  0xf4   : > { %837 = vperm.xlu1 %1358, %v834_v30  }
  0xf5   : > { %1360 = vset.pattern.permute.xlu0 %v1506_v12 }
  0xf6   : > { %880 = vperm.xlu0 %1360, %v877_v31  }
  0xf8   : > { %1359 = vset.pattern.permute.xlu1 %v1506_v12 }
  0xf9   : > { %866 = vperm.xlu1 %1359, %v863_v32  }
  0xfa   : > { %1362 = vset.pattern.permute.xlu0 %v1512_v19 }
  0xfb   : > { %946 = vperm.xlu0 %1362, %v898_v33  }
  0xfd   : > { %1361 = vset.pattern.permute.xlu1 %v1509_v15  ;;  %v1112_v15 = vcombine.high %v1706_v37, %v1706_v37 }
  0xfe   : > { %920 = vperm.xlu1 %1361, %v898_v33  }
  0xff   : > { %1365 = vset.pattern.permute.xlu0 %v1506_v12  ;;  %v321_v12 = vpop.permute.xlu1 %320  ;;  %v1369_v19 = vpack.i.bf16 %v1112_v15, %v1706_v37 }
 0x100   : > { %1025 = vperm.xlu0 %1365, %v898_v33   ;;  %v328_v50 = vrot.slane %v321_v12, %v1700_v26 }
 0x102   : > { %894 = vperm.xlu1 %1361, %v891_v34   ;;  %v330_v60 = vmul.f32 %v328_v50, %v316_v49 }
 0x104   : > { %1368 = vset.pattern.permute.xlu0 %v1502_v8  ;;  %v334_v8 = vpop.permute.xlu1 %333 }
 0x105   : > { %1103 = vperm.xlu0 %1368, %v898_v33   ;;  %v341_v56 = vrot.slane %v334_v8, %v1700_v26 }
 0x106   : > { %1363 = vset.pattern.permute.xlu1 %v1496_v1 }
 0x107   : > { %972 = vperm.xlu1 %1363, %v898_v33   ;;  %v343_v6 = vmul.f32 %v341_v56, %v316_v49 }
 0x108   : > { %v363_v1 = vpop.permute.xlu1 %362 }
 0x109   : > { %v370_v57 = vrot.slane %v363_v1, %v1700_v26 }
 0x10b   : > { %1364 = vset.pattern.permute.xlu1 %v1501_v7  ;;  %v372_v9 = vmul.f32 %v370_v57, %v347_v51 }
 0x10c   : > { %998 = vperm.xlu1 %1364, %v898_v33   ;;  %v379_v7 = vpop.permute.xlu1 %378 }
 0x10d   : > { %v386_v62 = vrot.slane %v379_v7, %v1700_v26  ;;  %v373_v27 = vadd.f32 %v372_v9, %v343_v6 }
 0x10f   : > { %v388_v16 = vmul.f32 %v386_v62, %v376_v58 }
 0x110   : > { %1366 = vset.pattern.permute.xlu1 %v1495_v0  ;;  %v350_v0 = vpop.permute.xlu0 %349  ;;  %v1774_v35 = vpop.permute.xlu1 %730 }
 0x111   : > { %1051 = vperm.xlu1 %1366, %v898_v33   ;;  %v357_v52 = vrot.slane %v350_v0, %v1700_v26 }
 0x113   : > { %v359_v61 = vmul.f32 %v357_v52, %v347_v51 }
 0x114   : > { %v392_v36 = vpop.permute.xlu0 %391 }
 0x115   : > { %1367 = vset.pattern.permute.xlu1 %v1499_v5  ;;  %v399_v10 = vrot.slane %v392_v36, %v1700_v26  ;;  %v360_v14 = vadd.f32 %v359_v61, %v330_v60 }
 0x116   : > { %1077 = vperm.xlu1 %1367, %v898_v33  }
 0x117   : > { %v401_v28 = vmul.f32 %v399_v10, %v376_v58  ;;  %v389_v34 = vadd.f32 %v388_v16, %v360_v14 }
 0x118   : > { %v1776_v38 = vpop.permute.xlu0 %718 }
 0x119   : > { %v402_v47 = vadd.f32 %v401_v28, %v373_v27 }
 0x11a   : > { %1370 = vrot.lane.b32.xlu1 %v1369_v19, %s1514_s10 }
 0x11e   : > { %1117 = vrot.lane.b32.xlu1 %v1713_v44, %s1514_s10  ;;  %s1249_s10 = sshll.u32 %s1482_s27, 7  ;;  %s1516_s27 = smov [#allocation5]  }
 0x11f   : > { %s1889_s23 = scalar_lea.hbm %s1945_s7, %s1249_s10  ;;  %s1412_s12 = sshll.u32 %s1516_s27, 4  ;;  %s1413_s12 = int_to_ptr.vmem [resolvable:$false] %s1412_s12 }
 0x120   : > { %s1414_s19 = scalar_lea.vmem %s1413_s12, 256  ;;  %p1415_p5 = scmp.lt.s32.totalorder %s1891_s18, %s1413_s12 }
 0x121   : > { %p1416_p13 = scmp.lt.s32.totalorder %s1414_s19, %s1408_s8 }
 0x123   : > { %p1417_p2 = por %p1416_p13, %p1415_p5 }
 0x125   : > { %p1418_p4 = pnand %p1417_p2, %p1411_p0 }
 0x132   : > { %v422_v5 = vpop.permute.xlu1 %421 }
 0x133   : > { %v425_v2 = vrot.slane %v422_v5, 4 }
 0x136   : > { %v424_v39 = vpop.permute.xlu1 %423 }
 0x137   : > { %v1778_v40 = vpop.permute.xlu0 %448  ;;  %v426_v59 = vrot.slane %v424_v39, 4 }
 0x138   : > { %v452_v17 = vrot.slane %v1778_v40, 4 }
 0x139   : > { %v428_v11 = vsel %vm427_vm0, %v425_v2, %v426_v59 }
 0x13a   : > { %v451_v37 = vpop.permute.xlu1 %450  ;;  %v430_v29 = vsel %vm429_vm1, %v422_v5, %v428_v11 }
 0x13b   : > { %v477_v41 = vpop.permute.xlu0 %476  ;;  %v453_v18 = vrot.slane %v451_v37, 4  ;;  %v432_v39 = vadd.f32 %v430_v29, %v389_v34  ;;  %v738_v29 = vrot.slane %v1774_v35, %v1700_v26 }
 0x13c   : > { %v480_v13 = vrot.slane %v477_v41, 4 }
 0x13d   : > { %v454_v15 = vsel %vm427_vm0, %v452_v17, %v453_v18 }
 0x13e   : > { %v479_v42 = vpop.permute.xlu1 %478 }
 0x13f   : > { %v1780_v43 = vpop.permute.xlu0 %501  ;;  %v481_v3 = vrot.slane %v479_v42, 4 }
 0x140   : > { %v505_v30 = vrot.slane %v1780_v43, 4 }
 0x141   : > { %v482_v21 = vsel %vm427_vm0, %v480_v13, %v481_v3 }
 0x142   : > { %v504_v44 = vpop.permute.xlu1 %503  ;;  %v483_v12 = vsel %vm429_vm1, %v477_v41, %v482_v21  ;;  %v455_v41 = vsel %vm429_vm1, %v1778_v40, %v454_v15 }
 0x143   : > { %v1782_v45 = vpop.permute.xlu0 %529  ;;  %v506_v31 = vrot.slane %v504_v44, 4  ;;  %v485_v49 = vadd.f32 %v483_v12, %v432_v39  ;;  %v457_v60 = vadd.f32 %v455_v41, %v402_v47 }
 0x144   : > { %v533_v22 = vrot.slane %v1782_v45, 4 }
 0x145   : > { %v507_v37 = vsel %vm427_vm0, %v505_v30, %v506_v31 }
 0x146   : > { %v532_v46 = vpop.permute.xlu1 %531  ;;  %v508_v58 = vsel %vm429_vm1, %v1780_v43, %v507_v37 }
 0x147   : > { %v1785_v48 = vpop.permute.xlu0 %554  ;;  %v534_v23 = vrot.slane %v532_v46, 4  ;;  %v510_v3 = vadd.f32 %v508_v58, %v457_v60 }
 0x148   : > { %v558_v19 = vrot.slane %v1785_v48, 4 }
 0x149   : > { %v535_v1 = vsel %vm427_vm0, %v533_v22, %v534_v23 }
 0x14a   : > { %v557_v54 = vpop.permute.xlu1 %556  ;;  %v536_v50 = vsel %vm429_vm1, %v1782_v45, %v535_v1 }
 0x14b   : > { %v1790_v55 = vpop.permute.xlu0 %579  ;;  %v559_v7 = vrot.slane %v557_v54, 4  ;;  %v538_v61 = vadd.f32 %v536_v50, %v485_v49 }
 0x14c   : > { %v583_v32 = vrot.slane %v1790_v55, 4 }
 0x14d   : > { %v560_v52 = vsel %vm427_vm0, %v558_v19, %v559_v7 }
 0x14e   : > { %v582_v63 = vpop.permute.xlu1 %581  ;;  %v561_v45 = vsel %vm429_vm1, %v1785_v48, %v560_v52 }
 0x14f   : > { %v1795_v4 = vpop.permute.xlu0 %605  ;;  %v584_v33 = vrot.slane %v582_v63, 4  ;;  %v563_v13 = vadd.f32 %v561_v45, %v510_v3 }
 0x150   : > { %v609_v44 = vrot.slane %v1795_v4, 4 }
 0x151   : > { %v585_v42 = vsel %vm427_vm0, %v583_v32, %v584_v33 }
 0x152   : > { %v608_v20 = vpop.permute.xlu1 %607  ;;  %v587_v59 = vsel %vm586_vm2, %v1790_v55, %v585_v42 }
 0x153   : > { %v633_v25 = vpop.permute.xlu0 %632  ;;  %v610_v46 = vrot.slane %v608_v20, 4  ;;  %v589_v6 = vadd.f32 %v587_v59, %v538_v61  ;;  %v726_v20 = vrot.slane %v1776_v38, %v1700_v26 }
 0x154   : > { %v635_v0 = vrot.slane %v633_v25, 4 }
 0x155   : > { %v611_v40 = vsel %vm427_vm0, %v609_v44, %v610_v46 }
 0x156   : > { %v631_v8 = vpop.permute.xlu1 %630  ;;  %v612_v55 = vsel %vm586_vm2, %v1795_v4, %v611_v40 }
 0x157   : > { %v634_v36 = vrot.slane %v631_v8, 4  ;;  %v658_v5 = vpop.permute.xlu0 %657  ;;  %v614_v21 = vadd.f32 %v612_v55, %v563_v13 }
 0x158   : > { %v660_v54 = vrot.slane %v658_v5, 4 }
 0x159   : > { %v636_v53 = vsel %vm427_vm0, %v634_v36, %v635_v0 }
 0x15a   : > { %v656_v51 = vpop.permute.xlu1 %655  ;;  %v637_v63 = vsel %vm586_vm2, %v631_v8, %v636_v53 }
 0x15b   : > { %v659_v56 = vrot.slane %v656_v51, 4  ;;  %v683_v57 = vpop.permute.xlu0 %682  ;;  %v639_v11 = vadd.f32 %v637_v63, %v589_v6 }
 0x15c   : > { %v685_v62 = vrot.slane %v683_v57, 4 }
 0x15d   : > { %v661_v9 = vsel %vm427_vm0, %v659_v56, %v660_v54 }
 0x15e   : > { %v681_v2 = vpop.permute.xlu1 %680  ;;  %v662_v17 = vsel %vm586_vm2, %v656_v51, %v661_v9 }
 0x15f   : > { %v684_v10 = vrot.slane %v681_v2, 4  ;;  %v708_v43 = vpop.permute.xlu0 %707  ;;  %v664_v25 = vadd.f32 %v662_v17, %v614_v21 }
 0x160   : > { %v710_v16 = vrot.slane %v708_v43, 4 }
 0x161   : > { %v686_v14 = vsel %vm427_vm0, %v684_v10, %v685_v62 }
 0x162   : > { %v687_v48 = vsel %vm586_vm2, %v681_v2, %v686_v14  ;;  %v706_v18 = vpop.permute.xlu1 %705 }
 0x163   : > { %v689_v22 = vadd.f32 %v687_v48, %v639_v11  ;;  %v709_v23 = vrot.slane %v706_v18, 4 }
 0x165   : > { %v728_v27 = vadd.f32 %v726_v20, %v689_v22  ;;  %v711_v4 = vsel %vm427_vm0, %v709_v23, %v710_v16 }
 0x166   : > { %v712_v28 = vsel %vm586_vm2, %v706_v18, %v711_v4 }
 0x167   : > { %v742_v30 = vcombine.high %v728_v27, %v728_v27  ;;  %v744_v31 = vsel %vm427_vm0, %v728_v27, 0.0  ;;  %v714_v32 = vadd.f32 %v712_v28, %v664_v25 }
 0x168   : > { %v745_v33 = vrot.slane %v744_v31, 4 }
 0x169   : > { %v751_v34 = vsel %vm427_vm0, %v742_v30, 0.0  ;;  %v740_v38 = vadd.f32 %v738_v29, %v714_v32 }
 0x16a   : > { %v746_v15 = vadd.f32 %v745_v33, %v744_v31  ;;  %v752_v12 = vrot.slane %v751_v34, 4 }
 0x16b   : > { %v759_v19 = vcombine.high %v740_v38, %v740_v38  ;;  %v761_v8 = vsel %vm427_vm0, %v740_v38, 0.0 }
 0x16c   : > { %v747_v1 = vrot.slane %v746_v15, 2  ;;  %v753_v7 = vadd.f32 %v752_v12, %v751_v34  ;;  %v762_v0 = vrot.slane %v761_v8, 4 }
 0x16d   : > { %v768_v36 = vsel %vm427_vm0, %v759_v19, 0.0 }
 0x16e   : > { %v748_v5 = vadd.f32 %v747_v1, %v746_v15  ;;  %v754_v35 = vrot.slane %v753_v7, 2  ;;  %v763_v39 = vadd.f32 %v762_v0, %v761_v8  ;;  %v769_v37 = vrot.slane %v768_v36, 4 }
 0x170   : > { %v755_v42 = vadd.f32 %v754_v35, %v753_v7  ;;  %v764_v44 = vrot.slane %v763_v39, 2  ;;  %v770_v46 = vadd.f32 %v769_v37, %v768_v36  ;;  %v749_v47 = vrot.slane %v748_v5, 1 }
 0x172   : > { %v765_v41 = vadd.f32 %v764_v44, %v763_v39  ;;  %v771_v49 = vrot.slane %v770_v46, 2  ;;  %v756_v50 = vrot.slane %v755_v42, 1  ;;  %v750_v53 = vadd.f32 %v749_v47, %v748_v5 }
 0x173   : > { %v838_v25 = vpop.permute.xlu1 %837 }
 0x174   : > { %v766_v51 = vrot.slane %v765_v41, 1  ;;  %v772_v52 = vadd.f32 %v771_v49, %v770_v46  ;;  %v757_v57 = vadd.f32 %v756_v50, %v755_v42  ;;  %v852_v49 = vpop.permute.xlu0 %851 }
 0x176   : > { %v767_v54 = vadd.f32 %v766_v51, %v765_v41  ;;  %v773_v56 = vrot.slane %v772_v52, 1  ;;  %v845_v51 = vrot.slane %v838_v25, %v1700_v26 }
 0x178   : > { %v774_v58 = vadd.f32 %v773_v56, %v772_v52  ;;  %v775_v59 = vadd.f32 %v767_v54, %v750_v53  ;;  %v867_v19 = vpop.permute.xlu1 %866  ;;  %v1848_v53 = vsub.s32 0, %v1696_v24  ;;  %v906_v54 = vsub.s32 4, %v1696_v24 }
 0x179   : > { %v1852_v56 = vsub.s32 2, %v1696_v24 }
 0x17a   : > { %v776_v60 = vadd.f32 %v774_v58, %v757_v57  ;;  %v777_v40 = vmul.f32 0.125, %v775_v59  ;;  %v859_v57 = vrot.slane %v852_v49, %v1700_v26  ;;  %v874_v59 = vrot.slane %v867_v19, %v1700_v26 }
 0x17c   : > { %v778_v61 = vmul.f32 0.125, %v776_v60  ;;  %v959_v60 = vsub.s32 6, %v1696_v24 }
 0x17d   : > { %v921_v39 = vpop.permute.xlu1 %920 }
 0x17e   : > { %v781_v62 = vcombine.low %v777_v40, %v778_v61  ;;  %v881_v61 = vpop.permute.xlu0 %880 }
 0x180   : > { %v784_v45 = vsub.f32 %v740_v38, %v781_v62  ;;  %v783_v63 = vsub.f32 %v728_v27, %v781_v62  ;;  %v1858_v62 = vsub.s32 3, %v1696_v24 }
 0x181   : > { %v895_v42 = vpop.permute.xlu1 %894 }
 0x182   : > { %v803_v2 = vmul.f32 %v784_v45, %v784_v45  ;;  %v785_v3 = vmul.f32 %v783_v63, %v783_v63 }
 0x184   : > { %v805_v6 = vcombine.high %v803_v2, %v803_v2  ;;  %v807_v9 = vsel %vm427_vm0, %v803_v2, 0.0  ;;  %v787_v10 = vcombine.high %v785_v3, %v785_v3  ;;  %v789_v43 = vsel %vm427_vm0, %v785_v3, 0.0 }
 0x185   : > { %v808_v55 = vrot.slane %v807_v9, 4  ;;  %v790_v11 = vrot.slane %v789_v43, 4  ;;  %v933_v2 = vsub.s32 5, %v1696_v24 }
 0x186   : > { %v814_v13 = vsel %vm427_vm0, %v805_v6, 0.0  ;;  %v796_v14 = vsel %vm427_vm0, %v787_v10, 0.0  ;;  %v973_v46 = vpop.permute.xlu1 %972 }
 0x187   : > { %v809_v16 = vadd.f32 %v808_v55, %v807_v9  ;;  %v815_v17 = vrot.slane %v814_v13, 4  ;;  %v791_v48 = vadd.f32 %v790_v11, %v789_v43  ;;  %v797_v18 = vrot.slane %v796_v14, 4 }
 0x188   : > { %v888_v9 = vrot.slane %v881_v61, %v1700_v26 }
 0x189   : > { %v810_v20 = vrot.slane %v809_v16, 2  ;;  %v816_v21 = vadd.f32 %v815_v17, %v814_v13  ;;  %v792_v22 = vrot.slane %v791_v48, 2  ;;  %v798_v23 = vadd.f32 %v797_v18, %v796_v14 }
 0x18b   : > { %v817_v27 = vrot.slane %v816_v21, 2  ;;  %v793_v4 = vadd.f32 %v792_v22, %v791_v48  ;;  %v799_v28 = vrot.slane %v798_v23, 2  ;;  %v811_v29 = vadd.f32 %v810_v20, %v809_v16  ;;  %v999_v40 = vpop.permute.xlu1 %998 }
 0x18d   : > { %v794_v30 = vrot.slane %v793_v4, 1  ;;  %v800_v31 = vadd.f32 %v799_v28, %v798_v23  ;;  %v812_v32 = vrot.slane %v811_v29, 1  ;;  %v818_v33 = vadd.f32 %v817_v27, %v816_v21  ;;  %v947_v21 = vpop.permute.xlu0 %946 }
 0x18f   : > { %v795_v34 = vadd.f32 %v794_v30, %v793_v4  ;;  %v801_v38 = vrot.slane %v800_v31, 1  ;;  %v813_v15 = vadd.f32 %v812_v32, %v811_v29  ;;  %v819_v12 = vrot.slane %v818_v33, 1 }
 0x190   : > { %v1052_v20 = vpop.permute.xlu1 %1051 }
 0x191   : > { %v802_v8 = vadd.f32 %v801_v38, %v800_v31  ;;  %v820_v1 = vadd.f32 %v819_v12, %v818_v33  ;;  %v821_v7 = vadd.f32 %v813_v15, %v795_v34 }
 0x193   : > { %v822_v0 = vadd.f32 %v820_v1, %v802_v8  ;;  %v823_v36 = vmul.f32 0.125, %v821_v7 }
 0x195   : > { %v824_v5 = vmul.f32 0.125, %v822_v0  ;;  %v825_v35 = vadd.f32 1e-06, %v823_v36 }
 0x197   : > { %v826_v37 = vadd.f32 1e-06, %v824_v5  ;;  %1374 = vrsqrt.f32 %v825_v35  ;;  %v1078_v5 = vpop.permute.xlu1 %1077 }
 0x199   : > { %1376 = vrsqrt.f32 %v826_v37  ;;  %v1026_v37 = vpop.permute.xlu0 %1025 }
 0x19b   : > { %v1371_v61 = vpop.permute.xlu1 %1370 }
 0x1a1   : > { %v1375_v44 = vpop.eup %1374 }
 0x1a3   : > { %v1377_v47 = vpop.eup %1376 }
 0x1a4   : > { %v831_v41 = vcombine.low %v1375_v44, %v1377_v47 }
 0x1a6   : > { %v833_v50 = vmul.f32 %v831_v41, %v783_v63  ;;  %v862_v52 = vmul.f32 %v831_v41, %v784_v45  ;;  %v985_v45 = vsub.s32 7, %v1696_v24  ;;  %v929_v63 = vsub.s32 1, %v1696_v24 }
 0x1a8   : > { %v847_v58 = vmul.f32 %v845_v51, %v833_v50  ;;  %v876_v6 = vmul.f32 %v874_v59, %v862_v52 }
 0x1aa   : > { %v861_v3 = vadd.f32 %v859_v57, %v847_v58  ;;  %v890_v24 = vadd.f32 %v888_v9, %v876_v6  ;;  %v1104_v9 = vpop.permute.xlu0 %1103 }
 0x1ac   : > { %v903_v10 = vrot.slane %v861_v3, %v1848_v53  ;;  %v907_v43 = vrot.slane %v861_v3, %v906_v54  ;;  %v956_v55 = vrot.slane %v861_v3, %v1852_v56  ;;  %v960_v11 = vrot.slane %v861_v3, %v959_v60 }
 0x1ad   : > { %v982_v13 = vrot.slane %v861_v3, %v1858_v62  ;;  %v986_v14 = vrot.slane %v861_v3, %v985_v45  ;;  %v930_v16 = vrot.slane %v861_v3, %v929_v63  ;;  %v934_v17 = vrot.slane %v861_v3, %v933_v2 }
 0x1ae   : > { %v913_v48 = vrot.slane %v903_v10, %v1848_v53  ;;  %v917_v18 = vrot.slane %v907_v43, %v1848_v53  ;;  %v966_v27 = vrot.slane %v956_v55, %v1852_v56  ;;  %v970_v4 = vrot.slane %v960_v11, %v1852_v56 }
 0x1af   : > { %v940_v22 = vrot.slane %v930_v16, %v929_v63  ;;  %v944_v26 = vrot.slane %v934_v17, %v929_v63  ;;  %v992_v28 = vrot.slane %v982_v13, %v1858_v62  ;;  %v996_v29 = vrot.slane %v986_v14, %v1858_v62 }
 0x1b0   : > { %v923_v23 = vmul.f32 %v921_v39, %v913_v48  ;;  %v924_v25 = vmul.f32 %v921_v39, %v917_v18  ;;  %v1035_v34 = vrot.slane %v890_v24, %v929_v63  ;;  %v1039_v38 = vrot.slane %v890_v24, %v933_v2  ;;  %v1118_v48 = vpop.permute.xlu1 %1117 }
 0x1b1   : > { %v949_v30 = vmul.f32 %v947_v21, %v940_v22  ;;  %v950_v31 = vmul.f32 %v947_v21, %v944_v26  ;;  %v1009_v15 = vrot.slane %v890_v24, %v1848_v53  ;;  %v1013_v12 = vrot.slane %v890_v24, %v906_v54 }
 0x1b2   : > { %v925_v32 = vadd.f32 %v923_v23, %v895_v42  ;;  %v926_v33 = vadd.f32 %v924_v25, %v895_v42  ;;  %v1061_v19 = vrot.slane %v890_v24, %v1852_v56  ;;  %v1065_v8 = vrot.slane %v890_v24, %v959_v60 }
 0x1b3   : > { %v975_v1 = vmul.f32 %v973_v46, %v966_v27  ;;  %v976_v7 = vmul.f32 %v973_v46, %v970_v4  ;;  %v1045_v35 = vrot.slane %v1035_v34, %v929_v63  ;;  %v1049_v39 = vrot.slane %v1039_v38, %v929_v63 }
 0x1b4   : > { %v951_v0 = vadd.f32 %v949_v30, %v925_v32  ;;  %v952_v36 = vadd.f32 %v950_v31, %v926_v33  ;;  %v1019_v44 = vrot.slane %v1009_v15, %v1848_v53  ;;  %v1023_v42 = vrot.slane %v1013_v12, %v1848_v53 }
 0x1b5   : > { %v1001_v47 = vmul.f32 %v999_v40, %v992_v28  ;;  %v1002_v41 = vmul.f32 %v999_v40, %v996_v29  ;;  %v1071_v54 = vrot.slane %v1061_v19, %v1852_v56  ;;  %v1075_v46 = vrot.slane %v1065_v8, %v1852_v56 }
 0x1b6   : > { %v977_v49 = vadd.f32 %v975_v1, %v951_v0  ;;  %v978_v50 = vadd.f32 %v976_v7, %v952_v36  ;;  %v1028_v51 = vmul.f32 %v1026_v37, %v1019_v44  ;;  %v1029_v52 = vmul.f32 %v1026_v37, %v1023_v42 }
 0x1b7   : > { %v1087_v59 = vrot.slane %v890_v24, %v1858_v62  ;;  %v1091_v60 = vrot.slane %v890_v24, %v985_v45  ;;  %v1054_v63 = vmul.f32 %v1052_v20, %v1045_v35  ;;  %v1055_v2 = vmul.f32 %v1052_v20, %v1049_v39 }
 0x1b8   : > { %v1003_v57 = vadd.f32 %v1001_v47, %v977_v49  ;;  %v1004_v58 = vadd.f32 %v1002_v41, %v978_v50  ;;  %v1080_v55 = vmul.f32 %v1078_v5, %v1071_v54  ;;  %v1081_v56 = vmul.f32 %v1078_v5, %v1075_v46 }
 0x1b9   : > { %v1097_v40 = vrot.slane %v1087_v59, %v1858_v62  ;;  %v1101_v6 = vrot.slane %v1091_v60, %v1858_v62  ;;  %v1373_v11 = vunpack.i.h.bf16 %v1371_v61  ;;  %v1372_v13 = vunpack.i.l.bf16 %v1371_v61 }
 0x1ba   : > { %v1030_v53 = vadd.f32 %v1028_v51, %v1003_v57  ;;  %v1031_v3 = vadd.f32 %v1029_v52, %v1004_v58 }
 0x1bb   : > { %v1106_v16 = vmul.f32 %v1104_v9, %v1097_v40  ;;  %v1107_v17 = vmul.f32 %v1104_v9, %v1101_v6  ;;  %v1119_v20 = vsel %vm429_vm1, %v1372_v13, %v1373_v11  ;;  %v1120_v62 = vsel %vm429_vm1, %v1373_v11, %v1118_v48 }
 0x1bc   : > { %v1056_v10 = vadd.f32 %v1054_v63, %v1030_v53  ;;  %v1057_v43 = vadd.f32 %v1055_v2, %v1031_v3 }
 0x1be   : > { %v1082_v14 = vadd.f32 %v1080_v55, %v1056_v10  ;;  %v1083_v45 = vadd.f32 %v1081_v56, %v1057_v43 }
 0x1c0   : > { %v1108_v18 = vadd.f32 %v1106_v16, %v1082_v14  ;;  %v1109_v24 = vadd.f32 %v1107_v17, %v1083_v45 }
 0x1c2   : > { %v1123_v21 = vadd.f32 %v1119_v20, %v1108_v18  ;;  %v1124_v22 = vadd.f32 %v1120_v62, %v1109_v24 }
 0x1c4   : > { %v1125_v26 = vmax.f32 %v1123_v21, 0.0  ;;  %v1126_v23 = vmax.f32 %v1124_v22, 0.0 }
 0x1c6   : > { %v1129_v25 = vcombine.low %v1125_v26, %v1126_v23 }
 0x1c8   : > { %1131 = vst [vmem:[%s314_s21] sm:$0xff] %v1129_v25 }
 0x1c9   : > { %1421 = shalt.err (!%p1418_p4)
}
 0x1ca   : > { %s1422_s22 = scalar_lea.hbm %s1889_s23, 128  ;;  %s1426_s10 = scalar_lea.hbm %s1945_s7, 256 }
 0x1cb   : > { %p1423_p6 = scmp.ne.s32.totalorder %s1889_s23, %s1422_s22  ;;  %p1427_p12 = scmp.lt.u32.totalorder %s1889_s23, %s1945_s7 }
 0x1cc   : > { %p1428_p1 = scmp.lt.u32.totalorder %s1426_s10, %s1422_s22  ;;  %p1430_p8 = scmp.lt.u32.totalorder %s1422_s22, %s1889_s23 }
 0x1cd   : > { %p1424_p7 = pnand %p1423_p6, %p1953_p9 }
 0x1ce   : > { %p1429_p3 = por %p1428_p1, %p1427_p12 }
 0x1cf   : > { %p1425_p10 = pneg %p1424_p7 }
 0x1d0   : > { %p1431_p11 = por %p1430_p8, %p1429_p3 }
 0x1d2   : > { %p1432_p0 = pnand %p1431_p11, %p1425_p10 }
 0x1d4   : > { %1435 = shalt.err (!%p1432_p0)
}
 0x1d5   : > { %1255 = dma.vmem_to_hbm [thread:$0]  (%p1953_p9), %s1891_s18, 128, %s1889_s23, %s1133_s13  }
 0x1d6 PF: > { %s1161_s20 = sand.u32 1, %s1470_s24   ;;  %p1954_p5 = scmp.ne.s32.totalorder %s1950_s16, 0 }
 0x1d7   : > { %p1955_p13 = scmp.ge.s32.totalorder %s1490_s29, 2  ;;  %s1162_s8 = scalar_lea.sflag [#allocation4], %s1161_s20 }
 0x1d9   : > { %p1262_p2 = pnand %p1955_p13, %p1954_p5 }
 0x1db   : > { %1465 = dma.done.wait (!%p1262_p2), %s1162_s8, 128  }
 0x1dc   : > { %1467 = vsyncadd (!%p1262_p2), %s1162_s8, 4294967168  ;;  %s23_s29 = sadd.s32 1, %s1490_s29   ;;  %s1956_s24 = smov %s1474_s25 }
 0x1dd   : > { %p20_p4 = scmp.ge.s32.totalorder %s23_s29, 4   ;;  %s1957_s25 = smov %s1478_s26 }
 0x1de   : > { %s1958_s26 = smov %s1613_s15  ;;  %s1959_s27 = smov %s1486_s28 }
 0x1df   : > { %s1960_s28 = smov %s1962_s9  ;;  %22 = sbr.rel (!%p20_p4) target bundleno = 6 (0x6), region = 95 }
 0x1e6   :  { %1167 = vsyncpa [#allocation3], 1 }
 0x1e7   :  { %1169 = vsyncpa [#allocation3 + $0x1], 1 }
 0x1e8   :  { %1170 = vsyncpa [#allocation4], 1 }
 0x1e9   :  { %1172 = vsyncpa [#allocation4 + $0x1], 1 }

</bundles_post_ra>
